<compile_context>
chip_gen: v6e
topology: v6e:2x2x1
jax: 0.10.0
libtpu: 0.0.40
codegen_flags: <defaults>
</compile_context>

<pallas_src>
import math

import jax
import jax.numpy as jnp
from jax.experimental import pallas as pl
from jax.experimental.pallas import tpu as pltpu  # noqa: F401  (TPU backend import)


def _flatten_alias_kernel(x_ref, o_ref):
    # The output buffer is aliased onto the input (input_output_aliases={0:0});
    # the flattened bytes are already in place.  Both refs live in ANY (HBM)
    # space, so no DMA is issued and there is nothing to do.
    del x_ref, o_ref


def flatten(x: jax.Array) -> jax.Array:
    """Equivalent of torch: x.view(x.size(0), -1) for an NCHW (or any ND) input."""
    n = x.shape[0]
    k = math.prod(x.shape[1:]) if x.ndim > 1 else 1
    out_shape = (n, k)

    # Zero-sized inputs: pure metadata reshape (a 0-element pallas_call is pointless).
    if n * k == 0:
        return x.reshape(out_shape)

    # Metadata-only collapse (this is exactly what torch .view does).
    slab = x.reshape(out_shape)

    # No grid, no tiling, no DMA: both operands stay where they are
    # (memory_space=pl.ANY) and the output aliases the input buffer.
    return pl.pallas_call(
        _flatten_alias_kernel,
        out_shape=jax.ShapeDtypeStruct(out_shape, x.dtype),
        in_specs=[pl.BlockSpec(memory_space=pl.ANY)],
        out_specs=pl.BlockSpec(memory_space=pl.ANY),
        input_output_aliases={0: 0},
    )(slab)


if __name__ == "__main__":
    key = jax.random.PRNGKey(0)
    x = jax.random.normal(key, (2, 4, 16, 16), dtype=jnp.float32)  # NCHW

    # Reference (same semantics as torch's x.view(x.size(0), -1)), computed
    # first so that x can be donated to the kernel call below.
    ref = jax.block_until_ready(x.reshape(x.shape[0], -1))

    # Donate the input so the aliased output is a true zero-copy view of it.
    flatten_fn = jax.jit(flatten, donate_argnums=(0,))
    out = jax.block_until_ready(flatten_fn(x))

    assert out.shape == (2, 4 * 16 * 16), out.shape
    assert out.dtype == ref.dtype
    assert jnp.array_equal(out, ref), "mismatch vs reference flatten"

    print("KERNEL_OK")
</pallas_src>

<mosaic_0001>
module attributes {stable_mosaic.version = 11 : i64} {
  func.func @_flatten_alias_kernel(%arg0: memref<2x1024xf32, #tpu.memory_space<any>>, %arg1: memref<2x1024xf32, #tpu.memory_space<any>>) attributes {dimension_semantics = [], scalar_prefetch = 0 : i64, scratch_operands = 0 : i64, tpu.core_type = #tpu.core_type<tc>} {
    return
  }
}

</mosaic_0001>

<bundles_post_ra>
// kernel: flatten.1
= control target key start
LH: loop header
LB: loop body
LE: loop exit
PB: predicated region body
PF: predicated region fallthrough
CT: control target
= control target key end

     0   :  { %s16_s0 = inlined_call_operand.hbm [shape: f32[2,1024], index: 0, kind: input, shape index: {}, may-alias: {0,1}]   ;;  %s17_s1 = inlined_call_operand.hbm [shape: f32[2,1024], index: 1, kind: output, shape index: {}, may-alias: {0,1}]  }

</bundles_post_ra>
